<compile_context>
chip_gen: v6e
topology: v6e:2x2x1
jax: 0.10.0
libtpu: 0.0.40
codegen_flags: <defaults>
</compile_context>

<pallas_src>
import functools
import numpy as np
import jax
import jax.numpy as jnp
from jax import lax
from jax.experimental import pallas as pl
from jax.experimental.pallas import tpu as pltpu

EPS = 1e-5


def _round_up(v, m):
    return ((v + m - 1) // m) * m


@functools.lru_cache(maxsize=1)
def _vmem_limit_bytes():
    # Generation-aware VMEM budget (v5e/v6e: 128 MiB physical, v7x: 64 MiB).
    try:
        cap = int(pltpu.get_tpu_info().vmem_capacity_bytes)
    except Exception:
        cap = 128 * 1024 * 1024
    return int(max(32 * 1024 * 1024, min(int(cap * 0.75), 100 * 1024 * 1024)))


def _cparams(n_axes):
    return pltpu.CompilerParams(dimension_semantics=("parallel",) * n_axes,
                                vmem_limit_bytes=_vmem_limit_bytes())


def _bn_affine(s, ss, count, gamma, beta):
    # Fold training-mode BatchNorm (batch stats, biased variance) into y = x*scale + shift.
    mean = s / count
    var = ss / count - mean * mean
    scale = gamma.astype(jnp.float32) * lax.rsqrt(var + EPS)
    shift = beta.astype(jnp.float32) - mean * scale
    return scale.reshape(1, -1), shift.reshape(1, -1)


# ------------------------ kernel A: conv1 (+ fused projection shortcut) + BN stats -----------
def _conv1_kernel(*refs, K, Cin, Cout, Lo, stride, has_proj, edge):
    if has_proj:
        xr_ref, w_ref, b1_ref, bsc_ref, y_ref, sc_ref, st_ref, slab_ref = refs
    else:
        xr_ref, w_ref, b1_ref, y_ref, st_ref, slab_ref = refs
    # In-kernel im2col: pack the K taps into the contraction dim of one matmul.
    # The wrapper pre-grouped the padded rows by `stride`, so every tap is a
    # contiguous (Lo, Cin) window of the input block (no strided loads needed).
    for t in range(K):
        q, r = divmod(t, stride)
        slab_ref[:, t * Cin:(t + 1) * Cin] = xr_ref[0, q:q + Lo, r * Cin:(r + 1) * Cin]
    res = jnp.dot(slab_ref[...], w_ref[...], preferred_element_type=jnp.float32)

    h = (res[:, :Cout] + b1_ref[...]).astype(y_ref.dtype)
    y_ref[0] = h
    hf = h.astype(jnp.float32)              # BN stats on the values that get normalized later
    st_ref[0, 0:1, :] = jnp.sum(hf, axis=0, keepdims=True)
    st_ref[0, 1:2, :] = jnp.sum(hf * hf, axis=0, keepdims=True)

    if has_proj:
        scr = res[:, Cout:]
        if edge:  # ceil-mode AvgPool: last window holds a single element -> undo the 0.5 factor
            rows = lax.broadcasted_iota(jnp.int32, (Lo, 1), 0)
            scr = jnp.where(rows == Lo - 1, scr * 2.0, scr)
        sc = (scr + bsc_ref[...]).astype(sc_ref.dtype)
        sc_ref[0] = sc
        scf = sc.astype(jnp.float32)
        st_ref[0, 2:3, :] = jnp.sum(scf, axis=0, keepdims=True)
        st_ref[0, 3:4, :] = jnp.sum(scf * scf, axis=0, keepdims=True)


def _conv_bn_pallas(x_nlc, conv, *, K, stride, cdt, shortcut=None):
    """Conv1d(K, stride, pad=(K-1)//2) + training-BN batch stats, optionally with the fused
    AvgPool(2,stride,ceil_mode)+Conv1x1 projection shortcut, as one Pallas kernel."""
    N, L, Cin = x_nlc.shape
    p = (K - 1) // 2
    Cout = conv["w"].shape[0]
    Lo = (L + 2 * p - K) // stride + 1
    has_proj = shortcut is not None

    # Single 1x zero-pad + free stride-grouping reshape; no K-fold im2col in HBM.
    Lpad = stride * ((K - 1) // stride + Lo)
    xp = jnp.pad(x_nlc.astype(cdt), ((0, 0), (p, Lpad - L - p), (0, 0)))
    xr = xp.reshape(N, Lpad // stride, stride * Cin)

    w1p = jnp.transpose(conv["w"], (2, 1, 0)).reshape(K * Cin, Cout)
    edge = False
    if has_proj:
        if K < 2:
            raise NotImplementedError("fused projection shortcut needs kernel_size >= 2")
        # AvgPool1d(2, stride, ceil_mode=True) output length must equal the conv output length.
        Lp = -(-max(L - 2, 0) // stride) + 1
        if (Lp - 1) * stride >= L:
            Lp -= 1
        assert Lp == Lo, (Lp, Lo)
        edge = (Lo - 1) * stride + 1 >= L
        wsc2 = jnp.transpose(shortcut["w"][:, :, 0], (1, 0))                  # (Cin, Cout)
        waug = jnp.zeros((K * Cin, Cout), jnp.float32)
        waug = waug.at[p * Cin:(p + 1) * Cin].set(0.5 * wsc2)
        waug = waug.at[(p + 1) * Cin:(p + 2) * Cin].set(0.5 * wsc2)
        wmat = jnp.concatenate([w1p, waug], axis=1).astype(cdt)               # (K*Cin, 2*Cout)
    else:
        wmat = w1p.astype(cdt)
    Ca = wmat.shape[1]
    row = lambda v: v.reshape(1, -1).astype(jnp.float32)

    n_stats = 4 if has_proj else 2
    in_args = [xr, wmat, row(conv["b"])]
    in_specs = [pl.BlockSpec((1, Lpad // stride, stride * Cin), lambda n: (n, 0, 0)),
                pl.BlockSpec((K * Cin, Ca), lambda n: (0, 0)),
                pl.BlockSpec((1, Cout), lambda n: (0, 0))]
    out_shape = [jax.ShapeDtypeStruct((N, Lo, Cout), cdt)]
    out_specs = [pl.BlockSpec((1, Lo, Cout), lambda n: (n, 0, 0))]
    if has_proj:
        in_args.append(row(shortcut["b"]))
        in_specs.append(pl.BlockSpec((1, Cout), lambda n: (0, 0)))
        out_shape.append(jax.ShapeDtypeStruct((N, Lo, Cout), cdt))
        out_specs.append(pl.BlockSpec((1, Lo, Cout), lambda n: (n, 0, 0)))
    out_shape.append(jax.ShapeDtypeStruct((N, n_stats, Cout), jnp.float32))
    out_specs.append(pl.BlockSpec((1, n_stats, Cout), lambda n: (n, 0, 0)))

    outs = pl.pallas_call(
        functools.partial(_conv1_kernel, K=K, Cin=Cin, Cout=Cout, Lo=Lo, stride=stride,
                          has_proj=has_proj, edge=edge),
        grid=(N,), in_specs=in_specs, out_specs=tuple(out_specs), out_shape=tuple(out_shape),
        scratch_shapes=[pltpu.VMEM((Lo, K * Cin), cdt)],
        compiler_params=_cparams(1),
    )(*in_args)

    st = jnp.sum(outs[-1], axis=0)                       # tiny cross-sample stat reduce
    scale, shift = _bn_affine(st[0], st[1], N * Lo, conv["g"], conv["beta"])
    if has_proj:
        ssc, tsc = _bn_affine(st[2], st[3], N * Lo, shortcut["g"], shortcut["beta"])
        return outs[0], scale, shift, outs[1], ssc, tsc
    return outs[0], scale, shift


# ------------------------ kernel B: BN affine (+ReLU) + conv(stride 1) + BN stats -------------
def _affine_conv_kernel(x_ref, s_ref, t_ref, w_ref, b_ref, o_ref, st_ref, slab_ref,
                        *, K, Cin, Lo, relu):
    p = (K - 1) // 2
    h = x_ref[0].astype(jnp.float32) * s_ref[...] + t_ref[...]
    if relu:
        h = jnp.maximum(h, 0.0)
    h = h.astype(slab_ref.dtype)
    # Pack the K taps into the contraction dimension of a single matmul (zero halo in VMEM).
    for t in range(K):
        off = t - p
        lo0 = max(0, -off)
        lo1 = Lo - max(0, off)
        col = slice(t * Cin, (t + 1) * Cin)
        if lo0 > 0:
            slab_ref[0:lo0, col] = jnp.zeros((lo0, Cin), slab_ref.dtype)
        if lo1 < Lo:
            slab_ref[lo1:Lo, col] = jnp.zeros((Lo - lo1, Cin), slab_ref.dtype)
        if lo1 > lo0:
            slab_ref[lo0:lo1, col] = h[lo0 + off:lo1 + off, :]
    o = jnp.dot(slab_ref[...], w_ref[...], preferred_element_type=jnp.float32) + b_ref[...]
    oc = o.astype(o_ref.dtype)
    o_ref[0] = oc
    of = oc.astype(jnp.float32)
    st_ref[0, 0:1, :] = jnp.sum(of, axis=0, keepdims=True)
    st_ref[0, 1:2, :] = jnp.sum(of * of, axis=0, keepdims=True)


def _affine_conv_bn_pallas(y, scale, shift, conv, *, K, relu, cdt):
    N, Lo, Cin = y.shape
    Cout = conv["w"].shape[0]
    wp = jnp.transpose(conv["w"], (2, 1, 0)).reshape(K * Cin, Cout).astype(cdt)
    row = lambda v: v.reshape(1, -1).astype(jnp.float32)
    o, st = pl.pallas_call(
        functools.partial(_affine_conv_kernel, K=K, Cin=Cin, Lo=Lo, relu=relu),
        grid=(N,),
        in_specs=[pl.BlockSpec((1, Lo, Cin), lambda n: (n, 0, 0)),
                  pl.BlockSpec((1, Cin), lambda n: (0, 0)),
                  pl.BlockSpec((1, Cin), lambda n: (0, 0)),
                  pl.BlockSpec((K * Cin, Cout), lambda n: (0, 0)),
                  pl.BlockSpec((1, Cout), lambda n: (0, 0))],
        out_specs=(pl.BlockSpec((1, Lo, Cout), lambda n: (n, 0, 0)),
                   pl.BlockSpec((1, 2, Cout), lambda n: (n, 0, 0))),
        out_shape=(jax.ShapeDtypeStruct((N, Lo, Cout), cdt),
                   jax.ShapeDtypeStruct((N, 2, Cout), jnp.float32)),
        scratch_shapes=[pltpu.VMEM((Lo, K * Cin), cdt)],
        compiler_params=_cparams(1),
    )(y, scale, shift, wp, row(conv["b"]))
    st = jnp.sum(st, axis=0)
    s2, t2 = _bn_affine(st[0], st[1], N * Lo, conv["g"], conv["beta"])
    return o, s2, t2


# ------------------------ kernel C: bn2 affine + shortcut + residual + ReLU (row-tiled) -------
def _combine_proj_kernel(o_ref, sc_ref, s2_ref, t2_ref, ssc_ref, tsc_ref, out_ref):
    o = o_ref[...].astype(jnp.float32) * s2_ref[...] + t2_ref[...]
    s = sc_ref[...].astype(jnp.float32) * ssc_ref[...] + tsc_ref[...]
    out_ref[...] = jnp.maximum(o + s, 0.0).astype(out_ref.dtype)


def _combine_id_kernel(o_ref, x_ref, s2_ref, t2_ref, out_ref):
    o = o_ref[...].astype(jnp.float32) * s2_ref[...] + t2_ref[...]
    out_ref[...] = jnp.maximum(o + x_ref[...].astype(jnp.float32), 0.0).astype(out_ref.dtype)


# ------------------------ XResBlock1d -------------------------------------------------------
def xresblock1d_forward_nlc(x_nlc, params, *, kernel_size=3, stride=1,
                            use_bf16=True, block_rows=1024, out_dtype=None):
    """XResBlock1d forward (training-mode BN), NLC in / NLC out (bf16 by default)."""
    N, L, Cin = x_nlc.shape
    K = kernel_size
    Cout = params["w1"].shape[0]
    has_proj = (stride != 1) or (Cin != Cout)
    cdt = jnp.bfloat16 if use_bf16 else jnp.float32
    out_dtype = cdt if out_dtype is None else out_dtype

    conv1 = {"w": params["w1"], "b": params["b1"], "g": params["g1"], "beta": params["beta1"]}
    conv2 = {"w": params["w2"], "b": params["b2"], "g": params["g2"], "beta": params["beta2"]}
    if has_proj:
        sc_p = {"w": params["w_sc"], "b": params["b_sc"],
                "g": params["g_sc"], "beta": params["beta_sc"]}
        h1, s1, t1, sc1, ssc, tsc = _conv_bn_pallas(x_nlc, conv1, K=K, stride=stride,
                                                    cdt=cdt, shortcut=sc_p)
    else:
        h1, s1, t1 = _conv_bn_pallas(x_nlc, conv1, K=K, stride=stride, cdt=cdt)
    Lo = h1.shape[1]

    o, s2, t2 = _affine_conv_bn_pallas(h1, s1, t1, conv2, K=K, relu=True, cdt=cdt)

    # Residual combine: purely mem-bound -> flatten to (N*Lo, Cout), large row tiles, bf16 IO.
    R = N * Lo
    TRr = _round_up(block_rows, 16)
    TR = R if R <= TRr else TRr
    nt = pl.cdiv(R, TR)
    rows = pl.BlockSpec((TR, Cout), lambda i: (i, 0))
    vec = pl.BlockSpec((1, Cout), lambda i: (0, 0))
    o2 = o.reshape(R, Cout)
    if has_proj:
        args = (o2, sc1.reshape(R, Cout), s2, t2, ssc, tsc)
        specs = [rows, rows, vec, vec, vec, vec]
        kern = _combine_proj_kernel
    else:
        args = (o2, x_nlc.reshape(R, Cout).astype(cdt), s2, t2)
        specs = [rows, rows, vec, vec]
        kern = _combine_id_kernel
    out = pl.pallas_call(
        kern, grid=(nt,), in_specs=specs, out_specs=rows,
        out_shape=jax.ShapeDtypeStruct((R, Cout), out_dtype),
        compiler_params=_cparams(1),
    )(*args)
    return out.reshape(N, Lo, Cout)


def xresblock1d_forward(x_ncl, params, *, kernel_size=3, stride=1,
                        use_bf16=True, block_rows=1024):
    """Standalone XResBlock1d forward: NCL f32 in, NCL f32 out (layout glue at the boundary)."""
    x_nlc = jnp.transpose(x_ncl, (0, 2, 1))
    out = xresblock1d_forward_nlc(x_nlc, params, kernel_size=kernel_size, stride=stride,
                                  use_bf16=use_bf16, block_rows=block_rows)
    return jnp.transpose(out.astype(jnp.float32), (0, 2, 1))


# ------------------------ stem tail: BN affine + ReLU + MaxPool1d(3,2,pad=1) ------------------
def _bnrelu_maxpool_kernel(xr_ref, s_ref, t_ref, o_ref, *, C):
    y = jnp.maximum(xr_ref[0].astype(jnp.float32) * s_ref[...] + t_ref[...], 0.0)
    ye = y[:, :C]           # rows 2l
    yo = y[:, C:]           # rows 2l+1
    prev = jnp.concatenate([jnp.zeros((1, C), jnp.float32), yo[:-1, :]], axis=0)  # rows 2l-1
    o_ref[0] = jnp.maximum(jnp.maximum(ye, yo), prev).astype(o_ref.dtype)


def _bnrelu_maxpool_pallas(y, scale, shift, *, cdt):
    N, L, C = y.shape
    # TODO(synk): odd L needs one extra (post-ReLU zero) row; the XResNet18 stem reaches this
    # point with even L for even input lengths, which is all this demo exercises.
    assert L % 2 == 0, "fused maxpool expects an even sequence length"
    Lp = L // 2
    yr = y.reshape(N, Lp, 2 * C)                          # free stride-2 row grouping
    s2 = jnp.concatenate([scale, scale], axis=1)
    t2 = jnp.concatenate([shift, shift], axis=1)
    return pl.pallas_call(
        functools.partial(_bnrelu_maxpool_kernel, C=C),
        grid=(N,),
        in_specs=[pl.BlockSpec((1, Lp, 2 * C), lambda n: (n, 0, 0)),
                  pl.BlockSpec((1, 2 * C), lambda n: (0, 0)),
                  pl.BlockSpec((1, 2 * C), lambda n: (0, 0))],
        out_specs=pl.BlockSpec((1, Lp, C), lambda n: (n, 0, 0)),
        out_shape=jax.ShapeDtypeStruct((N, Lp, C), cdt),
        compiler_params=_cparams(1),
    )(yr, s2, t2)


# ------------------------ head: AdaptiveAvgPool1d(1) + MLP + L2 normalize --------------------
def _head_kernel(x_ref, w1_ref, b1_ref, w2_ref, b2_ref, out_ref):
    x = x_ref[...].astype(jnp.float32)
    feat = jnp.mean(x, axis=1)                                         # AdaptiveAvgPool1d(1)
    h = jnp.dot(feat.astype(w1_ref.dtype), w1_ref[...],
                preferred_element_type=jnp.float32) + b1_ref[...]
    h = jnp.maximum(h, 0.0)
    z = jnp.dot(h.astype(w2_ref.dtype), w2_ref[...],
                preferred_element_type=jnp.float32) + b2_ref[...]
    nrm = jnp.sqrt(jnp.sum(z * z, axis=1, keepdims=True))
    out_ref[...] = (z / jnp.maximum(nrm, 1e-12)).astype(out_ref.dtype)  # F.normalize(dim=1)


def _head_pallas(y, proj, *, cdt):
    N, Lo, C = y.shape
    H = proj["w1"].shape[1]
    O = proj["w2"].shape[1]
    row = lambda v: v.reshape(1, -1).astype(jnp.float32)
    return pl.pallas_call(
        _head_kernel,
        grid=(1,),
        in_specs=[pl.BlockSpec((N, Lo, C), lambda i: (0, 0, 0)),
                  pl.BlockSpec((C, H), lambda i: (0, 0)),
                  pl.BlockSpec((1, H), lambda i: (0, 0)),
                  pl.BlockSpec((H, O), lambda i: (0, 0)),
                  pl.BlockSpec((1, O), lambda i: (0, 0))],
        out_specs=pl.BlockSpec((N, O), lambda i: (0, 0)),
        out_shape=jax.ShapeDtypeStruct((N, O), jnp.float32),
        compiler_params=_cparams(1),
    )(y, proj["w1"].astype(cdt), row(proj["b1"]), proj["w2"].astype(cdt), row(proj["b2"]))


# ------------------------ full XResNet18 forward ---------------------------------------------
def xresnet18_forward(x_ncl, net_params, *, use_bf16=True, block_rows=1024):
    cdt = jnp.bfloat16 if use_bf16 else jnp.float32
    x = jnp.transpose(x_ncl, (0, 2, 1))                      # NCL -> NLC once, at network entry
    st = net_params["stem"]
    # stem: conv-bn, conv-bn, conv-bn, ReLU (BN affines are applied inside the next kernel)
    y, s, t = _conv_bn_pallas(x, st[0], K=3, stride=2, cdt=cdt)
    y, s, t = _affine_conv_bn_pallas(y, s, t, st[1], K=3, relu=False, cdt=cdt)
    y, s, t = _affine_conv_bn_pallas(y, s, t, st[2], K=3, relu=False, cdt=cdt)
    y = _bnrelu_maxpool_pallas(y, s, t, cdt=cdt)             # bn3 + ReLU + MaxPool1d(3,2,pad=1)
    # residual stages (activations stay bf16 NLC between blocks)
    for stage, stage_stride in zip(net_params["blocks"], (1, 2, 2, 2)):
        for bi, bp in enumerate(stage):
            y = xresblock1d_forward_nlc(y, bp, kernel_size=3,
                                        stride=stage_stride if bi == 0 else 1,
                                        use_bf16=use_bf16, block_rows=block_rows)
    return _head_pallas(y, net_params["proj"], cdt=cdt)      # (N, out_dim), L2-normalized


# ------------------------ params -------------------------------------------------------------
def init_block_params(key, c_in, c_out, k=3):
    ks = jax.random.split(key, 10)
    nrm = lambda kk, shp, sc: sc * jax.random.normal(kk, shp, jnp.float32)
    return {
        "w1": nrm(ks[0], (c_out, c_in, k), 0.1), "b1": nrm(ks[1], (c_out,), 0.1),
        "g1": 1.0 + 0.2 * jax.random.normal(ks[2], (c_out,), jnp.float32),
        "beta1": nrm(ks[3], (c_out,), 0.1),
        "w2": nrm(ks[4], (c_out, c_out, k), 0.1), "b2": nrm(ks[5], (c_out,), 0.1),
        # NOTE: PyTorch zero-inits bn2.weight; a nonzero gamma is used here so the conv2/bn2
        # path is exercised numerically by the self-test (forward semantics are unchanged).
        "g2": 1.0 + 0.2 * jax.random.normal(ks[6], (c_out,), jnp.float32),
        "beta2": nrm(ks[7], (c_out,), 0.1),
        "w_sc": nrm(ks[8], (c_out, c_in, 1), 0.1), "b_sc": nrm(ks[9], (c_out,), 0.1),
        "g_sc": jnp.ones((c_out,), jnp.float32),
        "beta_sc": jnp.zeros((c_out,), jnp.float32),
    }


def init_conv_bn(key, c_in, c_out, k=3):
    k1, k2, k3, k4 = jax.random.split(key, 4)
    return {"w": 0.1 * jax.random.normal(k1, (c_out, c_in, k), jnp.float32),
            "b": 0.1 * jax.random.normal(k2, (c_out,), jnp.float32),
            "g": 1.0 + 0.2 * jax.random.normal(k3, (c_out,), jnp.float32),
            "beta": 0.1 * jax.random.normal(k4, (c_out,), jnp.float32)}


def init_net_params(key, cfg):
    kstem, kblocks, kproj = jax.random.split(key, 3)
    s1, s2, s3 = cfg["stem_channels"]
    ks = jax.random.split(kstem, 3)
    stem = [init_conv_bn(ks[0], cfg["in_channel"], s1),
            init_conv_bn(ks[1], s1, s2),
            init_conv_bn(ks[2], s2, s3)]
    blocks = []
    c_prev = s3
    kb = jax.random.split(kblocks, len(cfg["block_channels"]))
    for i, (c_out, n_blk) in enumerate(zip(cfg["block_channels"], cfg["layers"])):
        kk = jax.random.split(kb[i], n_blk)
        stage = [init_block_params(kk[0], c_prev, c_out)]
        for j in range(1, n_blk):
            stage.append(init_block_params(kk[j], c_out, c_out))
        blocks.append(stage)
        c_prev = c_out
    kp = jax.random.split(kproj, 4)
    H, O = cfg["proj_hidden"], cfg["out_dim"]
    # Linear weights are stored pre-transposed as (in, out) relative to PyTorch's (out, in).
    proj = {"w1": 0.1 * jax.random.normal(kp[0], (c_prev, H), jnp.float32),
            "b1": 0.1 * jax.random.normal(kp[1], (H,), jnp.float32),
            "w2": 0.1 * jax.random.normal(kp[2], (H, O), jnp.float32),
            "b2": 0.1 * jax.random.normal(kp[3], (O,), jnp.float32)}
    return {"stem": stem, "blocks": blocks, "proj": proj}


# ------------------------ pure-JAX references (mirror the PyTorch module) ---------------------
def _ref_conv1d(x, w, b, s, pad):
    y = lax.conv_general_dilated(x, w, window_strides=(s,), padding=[(pad, pad)],
                                 dimension_numbers=("NCH", "OIH", "NCH"),
                                 precision=lax.Precision.HIGHEST)
    return y + b[None, :, None]


def _ref_bn(x, g, beta):
    mean = jnp.mean(x, axis=(0, 2), keepdims=True)
    var = jnp.mean((x - mean) ** 2, axis=(0, 2), keepdims=True)
    return (x - mean) / jnp.sqrt(var + EPS) * g[None, :, None] + beta[None, :, None]


def _ref_block(x, p, k, stride):
    pad = (k - 1) // 2
    h = jnp.maximum(_ref_bn(_ref_conv1d(x, p["w1"], p["b1"], stride, pad),
                            p["g1"], p["beta1"]), 0.0)
    o = _ref_bn(_ref_conv1d(h, p["w2"], p["b2"], 1, pad), p["g2"], p["beta2"])
    N, Cin, L = x.shape
    Cout = p["w1"].shape[0]
    if stride != 1 or Cin != Cout:
        Lp = o.shape[2]
        cols = []
        for lo in range(Lp):
            s0 = lo * stride
            s1 = min(s0 + 2, L)
            cols.append(jnp.mean(x[:, :, s0:s1], axis=2, keepdims=True))
        pooled = jnp.concatenate(cols, axis=2)
        sc = _ref_bn(_ref_conv1d(pooled, p["w_sc"], p["b_sc"], 1, 0), p["g_sc"], p["beta_sc"])
    else:
        sc = x
    return jnp.maximum(o + sc, 0.0)


def _ref_xresnet18(x, P):
    st = P["stem"]
    h = _ref_bn(_ref_conv1d(x, st[0]["w"], st[0]["b"], 2, 1), st[0]["g"], st[0]["beta"])
    h = _ref_bn(_ref_conv1d(h, st[1]["w"], st[1]["b"], 1, 1), st[1]["g"], st[1]["beta"])
    h = _ref_bn(_ref_conv1d(h, st[2]["w"], st[2]["b"], 1, 1), st[2]["g"], st[2]["beta"])
    h = jnp.maximum(h, 0.0)
    h = lax.reduce_window(h, -jnp.inf, lax.max, (1, 1, 3), (1, 1, 2),
                          ((0, 0), (0, 0), (1, 1)))
    for stage, stage_stride in zip(P["blocks"], (1, 2, 2, 2)):
        for bi, bp in enumerate(stage):
            h = _ref_block(h, bp, 3, stage_stride if bi == 0 else 1)
    feat = jnp.mean(h, axis=2)
    z = jnp.maximum(jnp.dot(feat, P["proj"]["w1"], precision=lax.Precision.HIGHEST)
                    + P["proj"]["b1"], 0.0)
    z = jnp.dot(z, P["proj"]["w2"], precision=lax.Precision.HIGHEST) + P["proj"]["b2"]
    nrm = jnp.sqrt(jnp.sum(z * z, axis=1, keepdims=True))
    return z / jnp.maximum(nrm, 1e-12)


# ------------------------ self-test ----------------------------------------------------------
if __name__ == "__main__":
    key = jax.random.PRNGKey(0)

    # ---- standalone XResBlock1d checks (projection / identity / ceil-mode edge / bf16) ----
    block_cases = [
        # (N, Cin, Cout, L, stride, use_bf16, tol)
        (2, 4, 8, 31, 2, True, 5e-2),    # projection shortcut + ceil-mode edge window, bf16
        (2, 8, 8, 15, 1, False, 5e-3),   # identity shortcut, f32
        (2, 4, 8, 29, 2, False, 5e-3),   # projection shortcut + edge window, f32
    ]
    for (N, Cin, Cout, L, stride, bf16, tol) in block_cases:
        key, kx, kp = jax.random.split(key, 3)
        x = jax.random.normal(kx, (N, Cin, L), jnp.float32)
        bp = init_block_params(kp, Cin, Cout, 3)
        out = jax.block_until_ready(
            xresblock1d_forward(x, bp, kernel_size=3, stride=stride, use_bf16=bf16))
        ref = _ref_block(x, bp, 3, stride)
        np.testing.assert_allclose(np.asarray(out), np.asarray(ref), rtol=tol, atol=tol)

    # ---- full XResNet18 forward (reduced widths for a fast, small self-test) ----
    cfg = dict(in_channel=4, stem_channels=(8, 8, 16), block_channels=(16, 32, 64, 128),
               layers=(1, 1, 1, 1), proj_hidden=64, out_dim=16)
    key, kx, kp = jax.random.split(key, 3)
    x = jax.random.normal(kx, (2, cfg["in_channel"], 64), jnp.float32)
    P = init_net_params(kp, cfg)
    out = jax.block_until_ready(xresnet18_forward(x, P, use_bf16=False))
    ref = _ref_xresnet18(x, P)
    np.testing.assert_allclose(np.asarray(out), np.asarray(ref), rtol=2e-2, atol=2e-2)

    print("KERNEL_OK")
</pallas_src>

<mosaic_0001>
module attributes {stable_mosaic.version = 11 : i64} {
  func.func @_conv1_kernel(%arg0: i32, %arg1: memref<1x17x8xbf16, #tpu.memory_space<vmem>>, %arg2: memref<12x16xbf16, #tpu.memory_space<vmem>>, %arg3: memref<1x8xf32, #tpu.memory_space<vmem>>, %arg4: memref<1x8xf32, #tpu.memory_space<vmem>>, %arg5: memref<1x16x8xbf16, #tpu.memory_space<vmem>>, %arg6: memref<1x16x8xbf16, #tpu.memory_space<vmem>>, %arg7: memref<1x4x8xf32, #tpu.memory_space<vmem>>, %arg8: memref<16x12xbf16, #tpu.memory_space<vmem>>) attributes {dimension_semantics = [#tpu.dimension_semantics<parallel>], iteration_bounds = array<i64: 2>, scalar_prefetch = 0 : i64, scratch_operands = 1 : i64, tpu.core_type = #tpu.core_type<tc>, window_params = [{transform_indices = @transform_0, window_bounds = array<i64: 1, 17, 8>}, {pipeline_mode = #tpu.pipeline_mode<synchronous>, transform_indices = @transform_1, window_bounds = array<i64: 12, 16>}, {pipeline_mode = #tpu.pipeline_mode<synchronous>, transform_indices = @transform_2, window_bounds = array<i64: 1, 8>}, {pipeline_mode = #tpu.pipeline_mode<synchronous>, transform_indices = @transform_3, window_bounds = array<i64: 1, 8>}, {transform_indices = @transform_4, window_bounds = array<i64: 1, 16, 8>}, {transform_indices = @transform_5, window_bounds = array<i64: 1, 16, 8>}, {transform_indices = @transform_6, window_bounds = array<i64: 1, 4, 8>}]} {
    %c0 = arith.constant 0 : index
    %c0_0 = arith.constant 0 : index
    %c0_1 = arith.constant 0 : index
    %0 = vector.load %arg1[%c0, %c0_0, %c0_1] : memref<1x17x8xbf16, #tpu.memory_space<vmem>>, vector<1x16x4xbf16>
    %1 = vector.shape_cast %0 : vector<1x16x4xbf16> to vector<16x4xbf16>
    %c0_2 = arith.constant 0 : index
    %c0_3 = arith.constant 0 : index
    %2 = vector.load %arg8[%c0_2, %c0_3] : memref<16x12xbf16, #tpu.memory_space<vmem>>, vector<16x4xbf16>
    tpu.vector_store %arg8[%c0_2, %c0_3], %1 {strides = array<i32>} : memref<16x12xbf16, #tpu.memory_space<vmem>>, vector<16x4xbf16>,
    %c0_4 = arith.constant 0 : index
    %c0_5 = arith.constant 0 : index
    %c4 = arith.constant 4 : index
    %3 = vector.load %arg1[%c0_4, %c0_5, %c4] : memref<1x17x8xbf16, #tpu.memory_space<vmem>>, vector<1x16x4xbf16>
    %4 = vector.shape_cast %3 : vector<1x16x4xbf16> to vector<16x4xbf16>
    %c0_6 = arith.constant 0 : index
    %c4_7 = arith.constant 4 : index
    %5 = vector.load %arg8[%c0_6, %c4_7] : memref<16x12xbf16, #tpu.memory_space<vmem>>, vector<16x4xbf16>
    tpu.vector_store %arg8[%c0_6, %c4_7], %4 {strides = array<i32>} : memref<16x12xbf16, #tpu.memory_space<vmem>>, vector<16x4xbf16>,
    %c0_8 = arith.constant 0 : index
    %c1 = arith.constant 1 : index
    %c0_9 = arith.constant 0 : index
    %6 = vector.load %arg1[%c0_8, %c1, %c0_9] : memref<1x17x8xbf16, #tpu.memory_space<vmem>>, vector<1x16x4xbf16>
    %7 = vector.shape_cast %6 : vector<1x16x4xbf16> to vector<16x4xbf16>
    %c0_10 = arith.constant 0 : index
    %c8 = arith.constant 8 : index
    %8 = vector.load %arg8[%c0_10, %c8] : memref<16x12xbf16, #tpu.memory_space<vmem>>, vector<16x4xbf16>
    tpu.vector_store %arg8[%c0_10, %c8], %7 {strides = array<i32>} : memref<16x12xbf16, #tpu.memory_space<vmem>>, vector<16x4xbf16>,
    %c0_11 = arith.constant 0 : index
    %c0_12 = arith.constant 0 : index
    %9 = vector.load %arg8[%c0_11, %c0_12] : memref<16x12xbf16, #tpu.memory_space<vmem>>, vector<16x12xbf16>
    %c0_13 = arith.constant 0 : index
    %c0_14 = arith.constant 0 : index
    %10 = vector.load %arg2[%c0_13, %c0_14] : memref<12x16xbf16, #tpu.memory_space<vmem>>, vector<12x16xbf16>
    %cst = arith.constant dense<0.000000e+00> : vector<16x16xf32>
    %11 = tpu.matmul %9, %10, %cst {dimension_numbers = #tpu.dot_dimension_numbers<[1], [0], [0], [1], [0, 0, 1, 1], [], []>} : vector<16x12xbf16>, vector<12x16xbf16>, vector<16x16xf32> -> vector<16x16xf32>
    %12 = vector.extract_strided_slice %11 {offsets = [0, 0], sizes = [16, 8], strides = [1, 1]} : vector<16x16xf32> to vector<16x8xf32>
    %c0_15 = arith.constant 0 : index
    %c0_16 = arith.constant 0 : index
    %13 = vector.load %arg3[%c0_15, %c0_16] : memref<1x8xf32, #tpu.memory_space<vmem>>, vector<1x8xf32>
    %14 = vector.broadcast %13 : vector<1x8xf32> to vector<16x8xf32>
    %15 = arith.addf %12, %14 : vector<16x8xf32>
    %16 = arith.truncf %15 : vector<16x8xf32> to vector<16x8xbf16>
    %c0_17 = arith.constant 0 : index
    %c0_18 = arith.constant 0 : index
    %c0_19 = arith.constant 0 : index
    %17 = vector.load %arg5[%c0_17, %c0_18, %c0_19] : memref<1x16x8xbf16, #tpu.memory_space<vmem>>, vector<1x16x8xbf16>
    %18 = vector.shape_cast %17 : vector<1x16x8xbf16> to vector<16x8xbf16>
    %19 = vector.shape_cast %16 : vector<16x8xbf16> to vector<1x16x8xbf16>
    tpu.vector_store %arg5[%c0_17, %c0_18, %c0_19], %19 {strides = array<i32>} : memref<1x16x8xbf16, #tpu.memory_space<vmem>>, vector<1x16x8xbf16>,
    %20 = arith.extf %16 : vector<16x8xbf16> to vector<16x8xf32>
    %cst_20 = arith.constant dense<0.000000e+00> : vector<8xf32>
    %21 = vector.multi_reduction <add>, %20, %cst_20 [0] : vector<16x8xf32> to vector<8xf32>
    %22 = vector.shape_cast %21 : vector<8xf32> to vector<1x8xf32>
    %c0_21 = arith.constant 0 : index
    %c0_22 = arith.constant 0 : index
    %c0_23 = arith.constant 0 : index
    %23 = vector.load %arg7[%c0_21, %c0_22, %c0_23] : memref<1x4x8xf32, #tpu.memory_space<vmem>>, vector<1x1x8xf32>
    %24 = vector.shape_cast %23 : vector<1x1x8xf32> to vector<1x8xf32>
    %25 = vector.shape_cast %22 : vector<1x8xf32> to vector<1x1x8xf32>
    tpu.vector_store %arg7[%c0_21, %c0_22, %c0_23], %25 {strides = array<i32>} : memref<1x4x8xf32, #tpu.memory_space<vmem>>, vector<1x1x8xf32>,
    %26 = arith.mulf %20, %20 : vector<16x8xf32>
    %cst_24 = arith.constant dense<0.000000e+00> : vector<8xf32>
    %27 = vector.multi_reduction <add>, %26, %cst_24 [0] : vector<16x8xf32> to vector<8xf32>
    %28 = vector.shape_cast %27 : vector<8xf32> to vector<1x8xf32>
    %c0_25 = arith.constant 0 : index
    %c1_26 = arith.constant 1 : index
    %c0_27 = arith.constant 0 : index
    %29 = vector.load %arg7[%c0_25, %c1_26, %c0_27] : memref<1x4x8xf32, #tpu.memory_space<vmem>>, vector<1x1x8xf32>
    %30 = vector.shape_cast %29 : vector<1x1x8xf32> to vector<1x8xf32>
    %31 = vector.shape_cast %28 : vector<1x8xf32> to vector<1x1x8xf32>
    tpu.vector_store %arg7[%c0_25, %c1_26, %c0_27], %31 {strides = array<i32>} : memref<1x4x8xf32, #tpu.memory_space<vmem>>, vector<1x1x8xf32>,
    %32 = vector.extract_strided_slice %11 {offsets = [0, 8], sizes = [16, 8], strides = [1, 1]} : vector<16x16xf32> to vector<16x8xf32>
    %33 = tpu.iota {dimensions = array<i32: 0>} : vector<16x1xi32>
    %c15_i32 = arith.constant 15 : i32
    %34 = vector.broadcast %c15_i32 : i32 to vector<16x1xi32>
    %35 = arith.cmpi eq, %33, %34 : vector<16x1xi32>
    %cst_28 = arith.constant 2.000000e+00 : f32
    %36 = vector.broadcast %cst_28 : f32 to vector<16x8xf32>
    %37 = arith.mulf %32, %36 : vector<16x8xf32>
    %38 = vector.shape_cast %35 : vector<16x1xi1> to vector<16x1xi1>
    %39 = vector.broadcast %38 : vector<16x1xi1> to vector<16x8xi1>
    %40 = arith.select %39, %37, %32 : vector<16x8xi1>, vector<16x8xf32>
    %c0_29 = arith.constant 0 : index
    %c0_30 = arith.constant 0 : index
    %41 = vector.load %arg4[%c0_29, %c0_30] : memref<1x8xf32, #tpu.memory_space<vmem>>, vector<1x8xf32>
    %42 = vector.broadcast %41 : vector<1x8xf32> to vector<16x8xf32>
    %43 = arith.addf %40, %42 : vector<16x8xf32>
    %44 = arith.truncf %43 : vector<16x8xf32> to vector<16x8xbf16>
    %c0_31 = arith.constant 0 : index
    %c0_32 = arith.constant 0 : index
    %c0_33 = arith.constant 0 : index
    %45 = vector.load %arg6[%c0_31, %c0_32, %c0_33] : memref<1x16x8xbf16, #tpu.memory_space<vmem>>, vector<1x16x8xbf16>
    %46 = vector.shape_cast %45 : vector<1x16x8xbf16> to vector<16x8xbf16>
    %47 = vector.shape_cast %44 : vector<16x8xbf16> to vector<1x16x8xbf16>
    tpu.vector_store %arg6[%c0_31, %c0_32, %c0_33], %47 {strides = array<i32>} : memref<1x16x8xbf16, #tpu.memory_space<vmem>>, vector<1x16x8xbf16>,
    %48 = arith.extf %44 : vector<16x8xbf16> to vector<16x8xf32>
    %cst_34 = arith.constant dense<0.000000e+00> : vector<8xf32>
    %49 = vector.multi_reduction <add>, %48, %cst_34 [0] : vector<16x8xf32> to vector<8xf32>
    %50 = vector.shape_cast %49 : vector<8xf32> to vector<1x8xf32>
    %c0_35 = arith.constant 0 : index
    %c2 = arith.constant 2 : index
    %c0_36 = arith.constant 0 : index
    %51 = vector.load %arg7[%c0_35, %c2, %c0_36] : memref<1x4x8xf32, #tpu.memory_space<vmem>>, vector<1x1x8xf32>
    %52 = vector.shape_cast %51 : vector<1x1x8xf32> to vector<1x8xf32>
    %53 = vector.shape_cast %50 : vector<1x8xf32> to vector<1x1x8xf32>
    tpu.vector_store %arg7[%c0_35, %c2, %c0_36], %53 {strides = array<i32>} : memref<1x4x8xf32, #tpu.memory_space<vmem>>, vector<1x1x8xf32>,
    %54 = arith.mulf %48, %48 : vector<16x8xf32>
    %cst_37 = arith.constant dense<0.000000e+00> : vector<8xf32>
    %55 = vector.multi_reduction <add>, %54, %cst_37 [0] : vector<16x8xf32> to vector<8xf32>
    %56 = vector.shape_cast %55 : vector<8xf32> to vector<1x8xf32>
    %c0_38 = arith.constant 0 : index
    %c3 = arith.constant 3 : index
    %c0_39 = arith.constant 0 : index
    %57 = vector.load %arg7[%c0_38, %c3, %c0_39] : memref<1x4x8xf32, #tpu.memory_space<vmem>>, vector<1x1x8xf32>
    %58 = vector.shape_cast %57 : vector<1x1x8xf32> to vector<1x8xf32>
    %59 = vector.shape_cast %56 : vector<1x8xf32> to vector<1x1x8xf32>
    tpu.vector_store %arg7[%c0_38, %c3, %c0_39], %59 {strides = array<i32>} : memref<1x4x8xf32, #tpu.memory_space<vmem>>, vector<1x1x8xf32>,
    return
  }
  func.func @transform_0(%arg0: i32) -> (i32, i32, i32) {
    %c0_i32 = arith.constant 0 : i32
    %c0_i32_0 = arith.constant 0 : i32
    %c0_i32_1 = arith.constant 0 : i32
    return %arg0, %c0_i32, %c0_i32_0 : i32, i32, i32
  }
  func.func @transform_1(%arg0: i32) -> (i32, i32) {
    %c0_i32 = arith.constant 0 : i32
    %c0_i32_0 = arith.constant 0 : i32
    %c0_i32_1 = arith.constant 0 : i32
    return %c0_i32, %c0_i32_0 : i32, i32
  }
  func.func @transform_2(%arg0: i32) -> (i32, i32) {
    %c0_i32 = arith.constant 0 : i32
    %c0_i32_0 = arith.constant 0 : i32
    %c0_i32_1 = arith.constant 0 : i32
    return %c0_i32, %c0_i32_0 : i32, i32
  }
  func.func @transform_3(%arg0: i32) -> (i32, i32) {
    %c0_i32 = arith.constant 0 : i32
    %c0_i32_0 = arith.constant 0 : i32
    %c0_i32_1 = arith.constant 0 : i32
    return %c0_i32, %c0_i32_0 : i32, i32
  }
  func.func @transform_4(%arg0: i32) -> (i32, i32, i32) {
    %c0_i32 = arith.constant 0 : i32
    %c0_i32_0 = arith.constant 0 : i32
    %c0_i32_1 = arith.constant 0 : i32
    return %arg0, %c0_i32, %c0_i32_0 : i32, i32, i32
  }
  func.func @transform_5(%arg0: i32) -> (i32, i32, i32) {
    %c0_i32 = arith.constant 0 : i32
    %c0_i32_0 = arith.constant 0 : i32
    %c0_i32_1 = arith.constant 0 : i32
    return %arg0, %c0_i32, %c0_i32_0 : i32, i32, i32
  }
  func.func @transform_6(%arg0: i32) -> (i32, i32, i32) {
    %c0_i32 = arith.constant 0 : i32
    %c0_i32_0 = arith.constant 0 : i32
    %c0_i32_1 = arith.constant 0 : i32
    return %arg0, %c0_i32, %c0_i32_0 : i32, i32, i32
  }
}

</mosaic_0001>

<bundles_post_ra>
// kernel: tpu_custom_call.1
= control target key start
LH: loop header
LB: loop body
LE: loop exit
PB: predicated region body
PF: predicated region fallthrough
CT: control target
= control target key end

     0   :  { %12 = vsyncpa [#allocation4], 0  ;;  %s977_s0 = inlined_call_operand.vmem [shape: bf16[2,17,8], index: 0, kind: input, shape index: {}]   ;;  %s978_s1 = inlined_call_operand.vmem [shape: bf16[12,16], index: 1, kind: input, shape index: {}]   ;;  %s979_s2 = inlined_call_operand.vmem [shape: f32[1,8], index: 2, kind: input, shape index: {}]   ;;  %s980_s3 = inlined_call_operand.vmem [shape: f32[1,8], index: 3, kind: input, shape index: {}]   ;;  %s981_s4 = inlined_call_operand.vmem [shape: bf16[2,16,8], index: 4, kind: output, shape index: {0}]   ;;  %s982_s5 = inlined_call_operand.vmem [shape: bf16[2,16,8], index: 5, kind: output, shape index: {1}]   ;;  %s983_s6 = inlined_call_operand.hbm [shape: f32[2,4,8], index: 6, kind: output, shape index: {2}]  }
   0x1   :  { %14 = vsyncpa [#allocation4 + $0x1], 0  ;;  %s829_s21 = smov 0   ;;  %s831_s22 = smov 0  }
   0x2   :  { %s833_s23 = smov 0   ;;  %s835_s24 = smov 0  }
   0x3 LB: > { %s850_s25 = sadd.s32 4294967295, %s787_s24   ;;  %s644_s26 = sadd.s32 4294967294, %s787_s24   ;;  %s787_s24 = sphi %s835_s24, %s989_s24   ;;  %s783_s23 = sphi %s833_s23, %s988_s23   ;;  %s779_s22 = sphi %s831_s22, %s987_s22   ;;  %s775_s21 = sphi %s829_s21, %s986_s21  }
   0x4   : > { %s854_s27 = sadd.s32 1, %s787_s24   ;;  %s168_s28 = sadd.s32 1, %s783_s23 }
   0x5   : > { %s165_s29 = ssub.s32 %s787_s24, %s854_s27  ;;  %p178_p0 = scmp.ne.s32.totalorder %s783_s23, %s779_s22 }
   0x6   : > { %p166_p1 = scmp.eq.s32.totalorder %s165_s29, 0  ;;  %p179_p2 = scmp.eq.s32.totalorder %s850_s25, 1 }
   0x7   : > { %p184_p3 = scmp.ne.s32.totalorder %s779_s22, %s775_s21  ;;  %p185_p4 = scmp.eq.s32.totalorder %s644_s26, 1 }
   0x8   : > { %s865_s30 = scalar_select %p166_p1, %s783_s23, %s168_s28  }
   0x9   : > { %p867_p5 = por %p179_p2, %p178_p0  ;;  %p871_p6 = por %p185_p4, %p184_p3 }
   0xa   : > { %p647_p7 = scmp.ge.s32.totalorder %s787_s24, 1  ;;  %p220_p8 = scmp.lt.s32.totalorder %s787_s24, 3 }
   0xc   : > { %p221_p9 = pnand %p647_p7, %p220_p8 }
   0xd   : > { %p260_p10 = scmp.lt.s32.totalorder (!%p221_p9), %s850_s25, 1  ;;  %s791_s16 = smov (!%p221_p9), 8  }
   0xe   : > { %224 = sbr.rel (%p221_p9) target bundleno = 515 (0x203), region = 36  ;;  %s257_s11 = sand.u32 (!%p221_p9), 1, %s779_s22  }
   0xf   : > { %s648_s12 = sshll.u32 (!%p221_p9), %s257_s11, 2  ;;  %s792_s14 = smov (!%p221_p9), 120  }
  0x10   : > { %s664_s15 = sshll.u32 (!%p221_p9), %s850_s25, 6 }
  0x11   : > { %s929_s29 = scalar_lea.hbm (!%p221_p9), %s983_s6, %s664_s15 }
  0x13   : > { %s879_s9 = scalar_select %p260_p10, %s850_s25, 1  ;;  %vm289_vm0 = vsmask.f32 3328  ;;  %vm290_vm1 = vsmask.f32 7440  ;;  %vm278_vm2 = vcmask 27648   ;;  %v434_v30 = vlaneseq }
  0x14   : > { %vm283_vm3 = vcmask 60448   ;;  %v789_v16 = vmov 0.0   ;;  %v725_v17 = vld [vmem:[%s978_s1] sm:$0x3f]   ;;  %vm343_vm4 = vcmask 1045504   ;;  %vm790_vm5 = vmmov 0   ;;  %vm291_vm6 = vmor %vm289_vm0, %vm290_vm1 }
  0x15   : > { %s681_s10 = smul.u32 12, %s879_s9  ;;  %675 = vmatprep.subr.bf16.mxu0 %v789_v16  ;;  %677 = vmatprep.mubr.msk.bf16.mxu0 %vm790_vm5, %v789_v16  ;;  %v345_v20 = vsel %vm343_vm4, %v725_v17, 0  ;;  %v660_v25 = vld [vmem:[%s980_s3] ss:$0 sm:$0xff]  ;;  %vm322_vm7 = vcmask 93248   ;;  %vm339_vm8 = vcmask 97280  }
  0x16   : > { %676 = vmatpush3.bf16.msra.mxu0 %v345_v20  ;;  %453 = vrot.lane.b32.xlu1 %v660_v25, %s791_s16  ;;  %v435_v31 = vshrl.u32 %v434_v30, 7  ;;  %v657_v32 = vld [vmem:[%s979_s2] ss:$0 sm:$0xff]  ;;  %s667_s26 = sshll.u32 %s879_s9, 3  ;;  %vm405_vm9 = vcmask 60416   ;;  %vm410_vm11 = vcmask 64512  }
  0x17   : > { %s264_s13 = scalar_lea.vmem %s977_s0, %s681_s10  ;;  %s269_s10 = scalar_lea.vmem %s981_s4, %s667_s26  ;;  %vm474_vm12 = vcmask 130112   ;;  %vm420_vm13 = vcmask 57344  }
  0x18   : > { %v286_v0 = vld [vmem:[%s264_s13] sm:$0xf]  ;;  %v287_v1 = vld [vmem:[%s264_s13 + $0x4] sm:$0xf]  ;;  %v288_v2 = vld [vmem:[%s264_s13 + $0x8] sm:$0x1]  ;;  %s924_s19 = scalar_lea.vmem %s982_s5, %s667_s26 }
  0x19   : > { %v293_v3 = vshrl.u32 %v286_v0, 16  ;;  %v296_v4 = vshll.u32 %v286_v0, 16  ;;  %v302_v5 = vshll.u32 %v287_v1, 16  ;;  %v306_v6 = vshrl.u32 %v287_v1, 16  ;;  %v276_v7 = vld [vmem:[%s264_s13] sm:$0xf] }
  0x1a   : > { %v312_v8 = vshll.u32 %v288_v2, 16  ;;  %279 = vst.msk [vmem:[#allocation2] sm:$0xf] %vm278_vm2, %v276_v7  ;;  %v281_v9 = vld [vmem:[%s264_s13] sm:$0xf]  ;;  %v436_v34 = vadd.s32 8, %v435_v31 }
  0x1b   : > { %v277_v10 = vld [vmem:[%s264_s13 + $0x4] sm:$0xf]  ;;  %v295_v11 = vrot.slane %v293_v3, 4  ;;  %v298_v12 = vrot.slane %v296_v4, 5  ;;  %v304_v13 = vrot.slane %v302_v5, 5  ;;  %v308_v14 = vrot.slane %v306_v6, 4 }
  0x1c   : > { %284 = vst.msk [vmem:[#allocation2] sm:$0xf] %vm283_vm3, %v281_v9  ;;  %v282_v15 = vld [vmem:[%s264_s13 + $0x4] sm:$0xf]  ;;  %v314_v23 = vrot.slane %v312_v8, 5  ;;  %vm438_vm10 = vcmp.eq.s32.totalorder %v436_v34, 15 }
  0x1d   : > { %280 = vst.msk [vmem:[#allocation2 + $0x4] sm:$0xf] %vm278_vm2, %v277_v10  ;;  %v299_v18 = vor.u32 %v298_v12, %v295_v11  ;;  %v309_v19 = vor.u32 %v308_v14, %v304_v13  ;;  %s259_s13 = scalar_lea.vmem [#allocation3], %s648_s12  ;;  %s516_s25 = scalar_lea.sflag [#allocation4], %s257_s11 }
  0x1e   : > { %285 = vst.msk [vmem:[#allocation2 + $0x4] sm:$0xf] %vm283_vm3, %v282_v15  ;;  %s793_s26 = smov [#allocation3]  }
  0x1f   : > { %v300_v21 = vrot.slane %v299_v18, 4  ;;  %v310_v22 = vrot.slane %v309_v19, 4 }
  0x21   : > { %v305_v24 = vsel %vm291_vm6, %v300_v21, %v304_v13  ;;  %v315_v26 = vsel %vm291_vm6, %v310_v22, %v314_v23 }
  0x22   : > { %316 = vrot.lane.b32.xlu0 %v305_v24, %s791_s16 }
  0x26   : > { %318 = vrot.lane.b32.xlu0 %v315_v26, %s791_s16  ;;  %s535_s16 = sshll.u32 %s259_s13, 4  ;;  %s931_s16 = int_to_ptr.vmem [resolvable:$true] %s535_s16 }
  0x27   : > { %s727_s9 = scalar_lea.vmem %s931_s16, 64 }
  0x28   : > { %p728_p11 = scmp.ne.s32.totalorder %s931_s16, %s727_s9 }
  0x2a   : > { %p729_p12 = pnand %p728_p11, %p867_p5 }
  0x2c   : > { %p730_p13 = pneg %p729_p12 }
  0x88   : > { %v454_v39 = vpop.permute.xlu1 %453 }
  0x94   : > { %v317_v27 = vpop.permute.xlu0 %316 }
  0x95   : > { %323 = vst.msk [vmem:[#allocation2] sm:$0xf] %vm322_vm7, %v317_v27 }
  0x98   : > { %v319_v28 = vpop.permute.xlu0 %318 }
  0x99   : > { %324 = vst.msk [vmem:[#allocation2 + $0x4] sm:$0xf] %vm322_vm7, %v319_v28 }
  0xa0   : > { %v726_v29 = vld [vmem:[#allocation2] sm:$0xff]  }
  0xa1   : > { %678 = vmatmul.mubr.msk.bf16.vlgmr.msra.gmra.mxu0 %vm339_vm8, %v726_v29 }
 0x161   : > { %v381_v33 = vpop.f32.mrf.mxu0 }
 0x162   : > { %v395_v35 = vadd.f32 %v657_v32, %v381_v33  ;;  %v456_v46 = vadd.f32 %v454_v39, %v381_v33 }
 0x163   : > { %v679_v36 = vpop.f32.mrf.mxu0 }
 0x164   : > { %v669_v37 = vpack.c.bf16 %v395_v35, %v395_v35  ;;  %v671_v29 = vpack.c.bf16 %v456_v46, %v456_v46 }
 0x165   : > { %v384_v38 = vpop.f32.mrf.mxu0 }
 0x166   : > { %v396_v40 = vadd.f32 %v657_v32, %v384_v38  ;;  %v440_v41 = vmul.f32 2.0, %v384_v38  ;;  %406 = vst.msk [vmem:[%s269_s10] sm:$0xf] %vm405_vm9, %v669_v37 }
 0x167   : > { %v680_v42 = vpop.f32.mrf.mxu0 }
 0x168   : > { %v397_v43 = vpack.c.bf16 %v396_v40, %v395_v35  ;;  %v670_v44 = vpack.c.bf16 %v396_v40, %v396_v40  ;;  %v446_v45 = vsel %vm438_vm10, %v440_v41, %v384_v38 }
 0x169   : > { %v457_v47 = vadd.f32 %v454_v39, %v446_v45 }
 0x16a   : > { %v408_v48 = vunpack.c.l.bf16 %v397_v43  ;;  %v409_v49 = vunpack.c.h.bf16 %v397_v43  ;;  %407 = vst.msk [vmem:[%s269_s10 + $0x4] sm:$0xf] %vm405_vm9, %v670_v44  ;;  %s731_s10 = sshll.u32 %s793_s26, 4  ;;  %s732_s10 = int_to_ptr.vmem [resolvable:$false] %s731_s10 }
 0x16b   : > { %v458_v50 = vpack.c.bf16 %v457_v47, %v456_v46  ;;  %v672_v30 = vpack.c.bf16 %v457_v47, %v457_v47  ;;  %s733_s12 = scalar_lea.vmem %s732_s10, 128  ;;  %p734_p0 = scmp.lt.s32.totalorder %s931_s16, %s732_s10 }
 0x16c   : > { %v411_v51 = vsel %vm410_vm11, %v408_v48, 0.0  ;;  %v412_v52 = vsel %vm410_vm11, %v409_v49, 0.0  ;;  %v422_v53 = vmul.f32 %v408_v48, %v408_v48  ;;  %v423_v54 = vmul.f32 %v409_v49, %v409_v49  ;;  %p735_p1 = scmp.lt.s32.totalorder %s733_s12, %s727_s9 }
 0x16d   : > { %v413_v55 = vadd.f32 %v412_v52, %v411_v51  ;;  %v472_v56 = vunpack.c.l.bf16 %v458_v50  ;;  %v473_v57 = vunpack.c.h.bf16 %v458_v50 }
 0x16e   : > { %v424_v58 = vsel %vm410_vm11, %v422_v53, 0.0  ;;  %v425_v59 = vsel %vm410_vm11, %v423_v54, 0.0  ;;  %p736_p2 = por %p735_p1, %p734_p0 }
 0x16f   : > { %v414_v60 = vrot.slane %v413_v55, 4  ;;  %v426_v61 = vadd.f32 %v425_v59, %v424_v58  ;;  %v475_v62 = vsel %vm474_vm12, %v472_v56, 0.0  ;;  %v476_v63 = vsel %vm474_vm12, %v473_v57, 0.0 }
 0x170   : > { %v489_v0 = vmul.f32 %v472_v56, %v472_v56  ;;  %v490_v1 = vmul.f32 %v473_v57, %v473_v57  ;;  %v477_v2 = vadd.f32 %v476_v63, %v475_v62  ;;  %p737_p3 = pnand %p736_p2, %p730_p13 }
 0x171   : > { %v415_v3 = vadd.f32 %v414_v60, %v413_v55  ;;  %v427_v4 = vrot.slane %v426_v61, 4 }
 0x172   : > { %v478_v5 = vrot.slane %v477_v2, 4  ;;  %v491_v6 = vsel %vm474_vm12, %v489_v0, 0.0  ;;  %v492_v7 = vsel %vm474_vm12, %v490_v1, 0.0 }
 0x173   : > { %v416_v8 = vrot.slane %v415_v3, 2  ;;  %v428_v9 = vadd.f32 %v427_v4, %v426_v61  ;;  %v493_v10 = vadd.f32 %v492_v7, %v491_v6 }
 0x174   : > { %v479_v11 = vadd.f32 %v478_v5, %v477_v2 }
 0x175   : > { %v417_v12 = vadd.f32 %v416_v8, %v415_v3  ;;  %v429_v13 = vrot.slane %v428_v9, 2  ;;  %v494_v14 = vrot.slane %v493_v10, 4 }
 0x176   : > { %v480_v15 = vrot.slane %v479_v11, 2 }
 0x177   : > { %v495_v16 = vadd.f32 %v494_v14, %v493_v10  ;;  %v418_v17 = vrot.slane %v417_v12, 1  ;;  %v430_v18 = vadd.f32 %v429_v13, %v428_v9 }
 0x178   : > { %v481_v19 = vadd.f32 %v480_v15, %v479_v11 }
 0x179   : > { %v496_v20 = vrot.slane %v495_v16, 2  ;;  %v419_v21 = vadd.f32 %v418_v17, %v417_v12  ;;  %v431_v22 = vrot.slane %v430_v18, 1 }
 0x17a   : > { %v482_v23 = vrot.slane %v481_v19, 1 }
 0x17b   : > { %v497_v24 = vadd.f32 %v496_v20, %v495_v16  ;;  %421 = vst.msk [vmem:[%s259_s13] sm:$0x1] %vm420_vm13, %v419_v21  ;;  %v432_v25 = vadd.f32 %v431_v22, %v430_v18 }
 0x17c   : > { %v483_v26 = vadd.f32 %v482_v23, %v481_v19 }
 0x17d   : > { %v498_v27 = vrot.slane %v497_v24, 1  ;;  %433 = vst.msk [vmem:[%s259_s13 + $0x1] sm:$0x1] %vm420_vm13, %v432_v25 }
 0x17e   : > { %485 = vrot.lane.b32.xlu1 %v483_v26, %s792_s14 }
 0x17f   : > { %v499_v28 = vadd.f32 %v498_v27, %v497_v24 }
 0x181   : > { %501 = vrot.lane.b32.xlu0 %v499_v28, %s792_s14 }
 0x182   : > { %464 = vrot.lane.b32.xlu1 %v671_v29, %s792_s14 }
 0x185   : > { %466 = vrot.lane.b32.xlu0 %v672_v30, %s792_s14 }
 0x1f0   : > { %v486_v31 = vpop.permute.xlu1 %485 }
 0x1f1   : > { %488 = vst.msk [vmem:[%s259_s13 + $0x2] sm:$0x1] %vm420_vm13, %v486_v31 }
 0x1f3   : > { %v502_v32 = vpop.permute.xlu0 %501 }
 0x1f4   : > { %504 = vst.msk [vmem:[%s259_s13 + $0x3] sm:$0x1] %vm420_vm13, %v502_v32  ;;  %v465_v33 = vpop.permute.xlu1 %464 }
 0x1f5   : > { %470 = vst.msk [vmem:[%s924_s19] sm:$0xf] %vm405_vm9, %v465_v33 }
 0x1f6   : > { %740 = shalt.err (!%p737_p3)
}
 0x1f7   : > { %s741_s13 = scalar_lea.hbm %s929_s29, 64  ;;  %s745_s15 = scalar_lea.hbm %s983_s6, 128 }
 0x1f8   : > { %p742_p4 = scmp.ne.s32.totalorder %s929_s29, %s741_s13  ;;  %p746_p9 = scmp.lt.s32.totalorder %s929_s29, %s983_s6 }
 0x1f9   : > { %p747_p10 = scmp.lt.s32.totalorder %s745_s15, %s741_s13 }
 0x1fa   : > { %p743_p7 = pnand %p742_p4, %p867_p5 }
 0x1fb   : > { %p748_p11 = por %p747_p10, %p746_p9 }
 0x1fc   : > { %p744_p8 = pneg %p743_p7 }
 0x1fe   : > { %p749_p12 = pnand %p748_p11, %p744_p8 }
 0x200   : > { %752 = shalt.err (!%p749_p12)
}
 0x201   : > { %682 = dma.vmem_to_hbm [thread:$0]  (%p867_p5), %s931_s16, 64, %s929_s29, %s516_s25   ;;  %v467_v34 = vpop.permute.xlu0 %466 }
 0x202   : > { %471 = vst.msk [vmem:[%s924_s19 + $0x4] sm:$0xf] %vm405_vm9, %v467_v34 }
 0x203 PF: > { %p688_p13 = scmp.ge.s32.totalorder %s787_s24, 2  ;;  %s563_s20 = sand.u32 1, %s775_s21  }
 0x204   : > { %s564_s28 = scalar_lea.sflag [#allocation4], %s563_s20 }
 0x205   : > { %p685_p0 = pnand %p688_p13, %p871_p6 }
 0x207   : > { %p686_p1 = pneg %p685_p0 }
 0x209   : > { %770 = dma.done.wait (%p686_p1), %s564_s28, 64  }
 0x20a   : > { %772 = vsyncadd (%p686_p1), %s564_s28, 4294967232  ;;  %p17_p5 = scmp.ge.s32.totalorder %s854_s27, 4   ;;  %s986_s21 = smov %s779_s22 }
 0x20b   : > { %s987_s22 = smov %s783_s23  ;;  %s988_s23 = smov %s865_s30 }
 0x20c   : > { %s989_s24 = smov %s854_s27  ;;  %19 = sbr.rel (!%p17_p5) target bundleno = 3 (0x3), region = 95 }
 0x211   :  { %569 = vsyncpa [#allocation4], 1 }
 0x212   :  { %571 = vsyncpa [#allocation4 + $0x1], 1 }

</bundles_post_ra>
